<compile_context>
chip_gen: v7x
topology: tpu7x:2x2x1
jax: 0.10.0
libtpu: 0.0.40
codegen_flags: <defaults>
</compile_context>

<pallas_src>
import jax
import jax.numpy as jnp
from jax.experimental import pallas as pl
from jax.experimental.pallas import tpu as pltpu


_SMALL_B_MAX = 1024   # gridless-path cap (fixed, independent of tb)
_TB_CAP = 4096        # keeps double-buffered working set tiny even on v7x's 64 MiB VMEM


def qnet_kernel(x_ref, w1_ref, b1_ref, w2_ref, b2_ref, q_ref, a_ref):
    # x:  (IN, TB)   w1: (H, IN)   b1: (H, 1)
    # w2: (OUT, H)   b2: (OUT, 1)  q:  (OUT, TB)   a: (1, TB) int32
    x = x_ref[...]
    h = jnp.tanh(
        jnp.dot(w1_ref[...], x, preferred_element_type=jnp.float32) + b1_ref[...]
    )
    q = jnp.dot(w2_ref[...], h, preferred_element_type=jnp.float32) + b2_ref[...]
    q_ref[...] = q.astype(q_ref.dtype)

    # Fused act(), specialized for n_actions == 2 (CartPole): a sublane compare.
    # Strict ">" returns 0 on ties, matching jnp.argmax first-index semantics.
    a_ref[...] = (q[1:2, :] > q[0:1, :]).astype(jnp.int32)


def _round_up(n, m):
    return ((n + m - 1) // m) * m


def _pick_tb(B, tb):
    """Multiple-of-256 batch tile; capped; >=2 grid steps when B is large."""
    tb = max(256, min(_round_up(tb, 256), _TB_CAP))
    if B > 256:
        # Ensure at least two grid steps so the "parallel" axis can be split
        # across the 2 TensorCores on v7x.
        tb = min(tb, _round_up(pl.cdiv(B, 2), 256))
    return tb


def _qnet_small(x_t, w1, b1, w2, b2):
    """Gridless path for tiny batches: everything VMEM-resident, single pass."""
    _, B = x_t.shape
    OUT = w2.shape[0]
    vmem = pl.BlockSpec(memory_space=pltpu.MemorySpace.VMEM)
    return pl.pallas_call(
        qnet_kernel,
        out_shape=(
            jax.ShapeDtypeStruct((OUT, B), jnp.float32),
            jax.ShapeDtypeStruct((1, B), jnp.int32),
        ),
        in_specs=[vmem, vmem, vmem, vmem, vmem],
        out_specs=(vmem, vmem),
    )(x_t, w1, b1, w2, b2)


def _qnet_batched(x_t, w1, b1, w2, b2, *, tb):
    """Batch-tiled path for large B (replay batches / vectorized envs)."""
    IN, B = x_t.shape
    H = w1.shape[0]
    OUT = w2.shape[0]
    tb = _pick_tb(B, tb)
    return pl.pallas_call(
        qnet_kernel,
        out_shape=(
            jax.ShapeDtypeStruct((OUT, B), jnp.float32),
            jax.ShapeDtypeStruct((1, B), jnp.int32),
        ),
        grid=(pl.cdiv(B, tb),),
        in_specs=[
            pl.BlockSpec((IN, tb), lambda i: (0, i)),
            pl.BlockSpec((H, IN), lambda i: (0, 0)),    # weights VMEM-resident
            pl.BlockSpec((H, 1), lambda i: (0, 0)),
            pl.BlockSpec((OUT, H), lambda i: (0, 0)),
            pl.BlockSpec((OUT, 1), lambda i: (0, 0)),
        ],
        out_specs=(
            pl.BlockSpec((OUT, tb), lambda i: (0, i)),  # lane-dense outputs
            pl.BlockSpec((1, tb), lambda i: (0, i)),
        ),
        compiler_params=pltpu.CompilerParams(
            dimension_semantics=("parallel",)),
    )(x_t, w1, b1, w2, b2)


def qnet_forward_act(x, w1, b1, w2, b2, *, tb=2048, small_b_max=_SMALL_B_MAX):
    """Returns (q_values [B, OUT] f32, actions [B] i32) from one fused kernel.

    x: (B, IN).  Params are in PyTorch nn.Linear layout:
    w1 (H, IN), b1 (H, 1), w2 (OUT, H), b2 (OUT, 1).
    """
    assert w2.shape[0] == 2, "fused argmax is specialized for n_actions == 2"
    B = x.shape[0]
    x_t = x.T  # layout plumbing so the batch dimension rides the lane axis
    if B <= small_b_max:
        q_t, a_t = _qnet_small(x_t, w1, b1, w2, b2)
    else:
        q_t, a_t = _qnet_batched(x_t, w1, b1, w2, b2, tb=tb)
    return q_t.T, a_t[0]


def init_params(key, in_features=4, hidden=64, n_actions=2):
    # Deterministic init mimicking PyTorch nn.Linear default:
    # U(-1/sqrt(fan_in), 1/sqrt(fan_in)) for both weight and bias.
    k1, k2, k3, k4 = jax.random.split(key, 4)
    bound1 = 1.0 / jnp.sqrt(in_features)
    bound2 = 1.0 / jnp.sqrt(hidden)
    w1 = jax.random.uniform(k1, (hidden, in_features), jnp.float32, -bound1, bound1)
    b1 = jax.random.uniform(k2, (hidden, 1), jnp.float32, -bound1, bound1)
    w2 = jax.random.uniform(k3, (n_actions, hidden), jnp.float32, -bound2, bound2)
    b2 = jax.random.uniform(k4, (n_actions, 1), jnp.float32, -bound2, bound2)
    return w1, b1, w2, b2


if __name__ == "__main__":
    key = jax.random.PRNGKey(0)
    k_x, k_p, k_xb = jax.random.split(key, 3)

    # CartPole-v1: observation dim 4, action space size 2.
    B, IN, H, OUT = 2, 4, 64, 2
    x = jax.random.normal(k_x, (B, IN), jnp.float32)
    w1, b1, w2, b2 = init_params(k_p, IN, H, OUT)

    # --- tiny-batch / act() path: gridless, fused argmax ---
    q_values, actions = qnet_forward_act(x, w1, b1, w2, b2)
    q_values, actions = jax.block_until_ready((q_values, actions))

    ref_q = jnp.tanh(x @ w1.T + b1.T) @ w2.T + b2.T
    assert q_values.shape == (B, OUT)
    assert actions.shape == (B,)
    assert jnp.allclose(q_values, ref_q, atol=1e-5, rtol=1e-5)
    assert jnp.array_equal(actions, jnp.argmax(q_values, axis=-1))

    # --- batched path (replay-batch Q targets): tiled, lane-dense, forced via
    # small_b_max=0; B deliberately not a multiple of the tile so the masked
    # last block is exercised.
    BB = 640
    xb = jax.random.normal(k_xb, (BB, IN), jnp.float32)
    qb, ab = qnet_forward_act(xb, w1, b1, w2, b2, tb=256, small_b_max=0)
    qb, ab = jax.block_until_ready((qb, ab))

    ref_qb = jnp.tanh(xb @ w1.T + b1.T) @ w2.T + b2.T
    assert qb.shape == (BB, OUT)
    assert ab.shape == (BB,)
    assert jnp.allclose(qb, ref_qb, atol=1e-5, rtol=1e-5)
    assert jnp.array_equal(ab, jnp.argmax(qb, axis=-1))

    # TODO(synk): gymnasium env stepping / replay buffer are host-side glue,
    # intentionally not part of the kernel.
    print("KERNEL_OK")
</pallas_src>

<mosaic_0001>
module attributes {stable_mosaic.version = 11 : i64} {
  func.func @qnet_kernel(%arg0: memref<4x2xf32, #tpu.memory_space<vmem>>, %arg1: memref<64x4xf32, #tpu.memory_space<vmem>>, %arg2: memref<64x1xf32, #tpu.memory_space<vmem>>, %arg3: memref<2x64xf32, #tpu.memory_space<vmem>>, %arg4: memref<2x1xf32, #tpu.memory_space<vmem>>, %arg5: memref<2x2xf32, #tpu.memory_space<vmem>>, %arg6: memref<1x2xi32, #tpu.memory_space<vmem>>) attributes {dimension_semantics = [], scalar_prefetch = 0 : i64, scratch_operands = 0 : i64, tpu.core_type = #tpu.core_type<tc>} {
    %c0 = arith.constant 0 : index
    %c0_0 = arith.constant 0 : index
    %0 = vector.load %arg0[%c0, %c0_0] : memref<4x2xf32, #tpu.memory_space<vmem>>, vector<4x2xf32>
    %c0_1 = arith.constant 0 : index
    %c0_2 = arith.constant 0 : index
    %1 = vector.load %arg1[%c0_1, %c0_2] : memref<64x4xf32, #tpu.memory_space<vmem>>, vector<64x4xf32>
    %cst = arith.constant dense<0.000000e+00> : vector<64x2xf32>
    %2 = tpu.matmul %1, %0, %cst {dimension_numbers = #tpu.dot_dimension_numbers<[1], [0], [0], [1], [0, 0, 1, 1], [], []>} : vector<64x4xf32>, vector<4x2xf32>, vector<64x2xf32> -> vector<64x2xf32>
    %c0_3 = arith.constant 0 : index
    %c0_4 = arith.constant 0 : index
    %3 = vector.load %arg2[%c0_3, %c0_4] : memref<64x1xf32, #tpu.memory_space<vmem>>, vector<64x1xf32>
    %4 = vector.broadcast %3 : vector<64x1xf32> to vector<64x2xf32>
    %5 = arith.addf %2, %4 : vector<64x2xf32>
    %6 = math.tanh %5 : vector<64x2xf32>
    %c0_5 = arith.constant 0 : index
    %c0_6 = arith.constant 0 : index
    %7 = vector.load %arg3[%c0_5, %c0_6] : memref<2x64xf32, #tpu.memory_space<vmem>>, vector<2x64xf32>
    %cst_7 = arith.constant dense<0.000000e+00> : vector<2x2xf32>
    %8 = tpu.matmul %7, %6, %cst_7 {dimension_numbers = #tpu.dot_dimension_numbers<[1], [0], [0], [1], [0, 0, 1, 1], [], []>} : vector<2x64xf32>, vector<64x2xf32>, vector<2x2xf32> -> vector<2x2xf32>
    %c0_8 = arith.constant 0 : index
    %c0_9 = arith.constant 0 : index
    %9 = vector.load %arg4[%c0_8, %c0_9] : memref<2x1xf32, #tpu.memory_space<vmem>>, vector<2x1xf32>
    %10 = vector.broadcast %9 : vector<2x1xf32> to vector<2x2xf32>
    %11 = arith.addf %8, %10 : vector<2x2xf32>
    %c0_10 = arith.constant 0 : index
    %c0_11 = arith.constant 0 : index
    %12 = vector.load %arg5[%c0_10, %c0_11] : memref<2x2xf32, #tpu.memory_space<vmem>>, vector<2x2xf32>
    tpu.vector_store %arg5[%c0_10, %c0_11], %11 {strides = array<i32>} : memref<2x2xf32, #tpu.memory_space<vmem>>, vector<2x2xf32>,
    %13 = vector.extract_strided_slice %11 {offsets = [1, 0], sizes = [1, 2], strides = [1, 1]} : vector<2x2xf32> to vector<1x2xf32>
    %14 = vector.extract_strided_slice %11 {offsets = [0, 0], sizes = [1, 2], strides = [1, 1]} : vector<2x2xf32> to vector<1x2xf32>
    %15 = arith.cmpf ogt, %13, %14 : vector<1x2xf32>
    %16 = arith.extui %15 : vector<1x2xi1> to vector<1x2xi32>
    %c0_12 = arith.constant 0 : index
    %c0_13 = arith.constant 0 : index
    %17 = vector.load %arg6[%c0_12, %c0_13] : memref<1x2xi32, #tpu.memory_space<vmem>>, vector<1x2xi32>
    tpu.vector_store %arg6[%c0_12, %c0_13], %16 {strides = array<i32>} : memref<1x2xi32, #tpu.memory_space<vmem>>, vector<1x2xi32>,
    return
  }
}

</mosaic_0001>

<bundles_post_ra>
// kernel: tpu_custom_call.1
= control target key start
LH: loop header
LB: loop body
LE: loop exit
PB: predicated region body
PF: predicated region fallthrough
CT: control target
= control target key end

     0   :  { %12 = vsyncpa [#allocation3], 0  ;;  %vm106_vm0 = vcmask 1043456   ;;  %vm81_vm1 = vcmask 31744   ;;  %v486_v4 = vmov 0   ;;  %s619_s0 = inlined_call_operand.vmem [shape: f32[4,2], index: 0, kind: input, shape index: {}]   ;;  %s620_s1 = inlined_call_operand.vmem [shape: f32[64,4], index: 1, kind: input, shape index: {}]   ;;  %s621_s2 = inlined_call_operand.vmem [shape: f32[64,1], index: 2, kind: input, shape index: {}]   ;;  %s622_s3 = inlined_call_operand.vmem [shape: f32[2,64], index: 3, kind: input, shape index: {}]   ;;  %s623_s4 = inlined_call_operand.vmem [shape: f32[2,1], index: 4, kind: input, shape index: {}]   ;;  %s624_s5 = inlined_call_operand.hbm [shape: f32[2,2], index: 5, kind: output, shape index: {0}]   ;;  %s625_s6 = inlined_call_operand.hbm [shape: s32[1,2], index: 6, kind: output, shape index: {1}]  }
   0x1   :  { %v24_v0 = vld [vmem:[%s619_s0] sm:$0xf]  ;;  %v26_v2 = vld [vmem:[%s620_s1 + $0x8] sm:$0xff]  ;;  %v27_v3 = vld [vmem:[%s620_s1 + $0x10] sm:$0xff]  ;;  %420 = vset.pattern.permute.xlu0 %v486_v4  ;;  %421 = vset.pattern.permute.xlu1 %v486_v4 }
   0x2   :  { %v25_v1 = vld [vmem:[%s620_s1] sm:$0xff]  ;;  %369 = vmatprep.subr.msk.mxu0 %vm106_vm0, %v24_v0  ;;  %v35_v6 = vld [vmem:[%s621_s2 + $0x10] sm:$0xff]  ;;  %v28_v7 = vld [vmem:[%s620_s1 + $0x18] sm:$0xff] }
   0x3   :  { %371 = vmatprep.mubr.msk.f32.mxu0 %vm81_vm1, %v25_v1  ;;  %370 = vmatpush3.msk.msra.mxu0 %vm106_vm0, %v24_v0  ;;  %v33_v5 = vld [vmem:[%s621_s2] sm:$0xff]  ;;  %v34_v9 = vld [vmem:[%s621_s2 + $0x8] sm:$0xff]  ;;  %v36_v10 = vld [vmem:[%s621_s2 + $0x18] sm:$0xff] }
   0x4   :  { %372 = vmatmul.mubr.msk.f32.vlgmr.msra.gmra.mrb[0].mxu0 %vm81_vm1, %v26_v2  ;;  %43 = vperm.xlu0 %420, %v33_v5   ;;  %v29_v8 = vld [vmem:[%s620_s1 + $0x20] sm:$0xff] }
   0x5   :  { %374 = vmatprep.mubr.msk.f32.mxu0 %vm81_vm1, %v27_v3  ;;  %53 = vperm.xlu1 %421, %v35_v6  }
   0x6   :  { %13 = vsyncpa [#allocation5], 0  ;;  %v30_v11 = vld [vmem:[%s620_s1 + $0x28] sm:$0xff]  ;;  %v31_v12 = vld [vmem:[%s620_s1 + $0x30] sm:$0xff]  ;;  %v487_v19 = vmov 0.0|0.0   ;;  %vm488_vm2 = vmmov 0  }
   0x7   :  { %v37_v13 = vld [vmem:[%s621_s2 + $0x20] sm:$0xff]  ;;  %v38_v14 = vld [vmem:[%s621_s2 + $0x28] sm:$0xff]  ;;  %v32_v15 = vld [vmem:[%s620_s1 + $0x38] sm:$0xff]  ;;  %402 = vmatprep.subr.bf16.mxu1 %v487_v19  ;;  %v489_v20 = vmov 0.0   ;;  %vm230_vm3 = vcmask 523264   ;;  %vm304_vm4 = vcmask 9216  }
   0x8   :  { %375 = vmatmul.mubr.msk.f32.gmra.mrb[2].mxu0 %vm81_vm1, %v28_v7  ;;  %48 = vperm.xlu0 %420, %v34_v9   ;;  %v39_v16 = vld [vmem:[%s621_s2 + $0x30] sm:$0xff]  ;;  %v40_v17 = vld [vmem:[%s621_s2 + $0x38] sm:$0xff]  ;;  %v224_v18 = vld [vmem:[%s623_s4] sm:$0x3]  ;;  %s490_s4 = smov [#allocation2]   ;;  %s491_s8 = smov [#allocation4]  }
   0x9   :  { %377 = vmatprep.mubr.msk.f32.mxu0 %vm81_vm1, %v29_v8  ;;  %58 = vperm.xlu1 %421, %v36_v10   ;;  %v223_v57 = vld [vmem:[%s622_s3] sm:$0x3]  ;;  %s319_s7 = sshll.u32 %s490_s4, 4  ;;  %s329_s9 = sshll.u32 %s491_s8, 4  ;;  %s320_s7 = int_to_ptr.vmem [resolvable:$true] %s319_s7  ;;  %s330_s9 = int_to_ptr.vmem [resolvable:$true] %s329_s9 }
   0xa   :  { %399 = vmatprep.mubr.msk.f32.mxu1 %vm488_vm2, %v489_v20  ;;  %s438_s10 = scalar_lea.vmem %s320_s7, 32  ;;  %p443_p1 = scmp.lt.s32.totalorder %s320_s7, %s320_s7 }
   0xb   :  { %p439_p0 = scmp.ne.s32.totalorder %s320_s7, %s438_s10  ;;  %p444_p2 = scmp.lt.s32.totalorder %s438_s10, %s438_s10 }
   0xc   :  { %378 = vmatmul.mubr.msk.f32.gmra.mrb[4].mxu0 %vm81_vm1, %v30_v11  ;;  %63 = vperm.xlu0 %420, %v37_v13  }
   0xd   :  { %380 = vmatprep.mubr.msk.f32.mxu0 %vm81_vm1, %v31_v12  ;;  %68 = vperm.xlu1 %421, %v38_v14   ;;  %p445_p3 = por %p444_p2, %p443_p1 }
   0xf   :  { %p446_p4 = pnand %p445_p3, %p439_p0 }
  0x10   :  { %381 = vmatmul.mubr.msk.f32.gmra.mrb[6].mxu0 %vm81_vm1, %v32_v15  ;;  %73 = vperm.xlu0 %420, %v39_v16  }
  0x11   :  { %78 = vperm.xlu1 %421, %v40_v17  }
  0x14   :  { %227 = vperm.xlu0 %420, %v224_v18  }
  0x83   :  { %v44_v21 = vpop.permute.xlu0 %43 }
  0x84   :  { %v54_v22 = vpop.permute.xlu1 %53 }
  0x87   :  { %v49_v23 = vpop.permute.xlu0 %48 }
  0x88   :  { %v59_v24 = vpop.permute.xlu1 %58 }
  0x8b   :  { %v64_v34 = vpop.permute.xlu0 %63 }
  0x8c   :  { %v69_v32 = vpop.permute.xlu1 %68 }
  0x8f   :  { %v74_v42 = vpop.permute.xlu0 %73 }
  0x90   :  { %v79_v39 = vpop.permute.xlu1 %78 }
  0x93   :  { %v228_v58 = vpop.permute.xlu0 %227 }
  0xd7   :  { %v373_v25 = vpop.f32.mrb[0].mxu0 }
  0xd8   :  { %v182_v26 = vadd.f32 %v373_v25, %v49_v23  ;;  %v176_v27 = vpop.f32.mrb[1].mxu0 }
  0xd9   :  { %v177_v28 = vadd.f32 %v176_v27, %v44_v21 }
  0xda   :  { %422 = vtanh.f32 %v182_v26 }
  0xdb   :  { %424 = vtanh.f32 %v177_v28  ;;  %v376_v29 = vpop.f32.mrb[2].mxu0 }
  0xdc   :  { %v192_v30 = vadd.f32 %v376_v29, %v59_v24  ;;  %v186_v31 = vpop.f32.mrb[3].mxu0 }
  0xdd   :  { %v187_v33 = vadd.f32 %v186_v31, %v54_v22 }
  0xde   :  { %426 = vtanh.f32 %v192_v30 }
  0xdf   :  { %428 = vtanh.f32 %v187_v33  ;;  %v379_v35 = vpop.f32.mrb[4].mxu0 }
  0xe0   :  { %v202_v36 = vadd.f32 %v379_v35, %v69_v32  ;;  %v196_v37 = vpop.f32.mrb[5].mxu0 }
  0xe1   :  { %v197_v38 = vadd.f32 %v196_v37, %v64_v34 }
  0xe2   :  { %430 = vtanh.f32 %v202_v36 }
  0xe3   :  { %432 = vtanh.f32 %v197_v38  ;;  %v382_v40 = vpop.f32.mrb[6].mxu0 }
  0xe4   :  { %v423_v41 = vpop.eup %422  ;;  %v212_v43 = vadd.f32 %v382_v40, %v79_v39  ;;  %v206_v44 = vpop.f32.mrb[7].mxu0 }
  0xe5   :  { %v425_v45 = vpop.eup %424  ;;  %v207_v46 = vadd.f32 %v206_v44, %v74_v42 }
  0xe6   :  { %434 = vtanh.f32 %v212_v43  ;;  %v403_v47 = vpack.c.bf16 %v423_v41, %v425_v45 }
  0xe7   :  { %436 = vtanh.f32 %v207_v46 }
  0xe8   :  { %v427_v48 = vpop.eup %426  ;;  %404 = vmatpush3.bf16.msra.mxu1 %v403_v47 }
  0xe9   :  { %v429_v49 = vpop.eup %428  ;;  %405 = vmatprep.subr.bf16.mxu1 %v487_v19 }
  0xea   :  { %v406_v50 = vpack.c.bf16 %v427_v48, %v429_v49 }
  0xec   :  { %v431_v51 = vpop.eup %430  ;;  %407 = vmatpush3.bf16.msra.mxu1 %v406_v50 }
  0xed   :  { %v433_v52 = vpop.eup %432  ;;  %408 = vmatprep.subr.bf16.mxu1 %v487_v19 }
  0xee   :  { %v409_v53 = vpack.c.bf16 %v431_v51, %v433_v52 }
  0xf0   :  { %v435_v54 = vpop.eup %434  ;;  %410 = vmatpush3.bf16.msra.mxu1 %v409_v53 }
  0xf1   :  { %v437_v55 = vpop.eup %436  ;;  %411 = vmatprep.subr.bf16.mxu1 %v487_v19 }
  0xf2   :  { %v412_v56 = vpack.c.bf16 %v435_v54, %v437_v55 }
  0xf4   :  { %413 = vmatpush3.bf16.msra.mxu1 %v412_v56 }
  0xf7   :  { %400 = vmatmul.mubr.msk.f32.vlgmr.msra.gmra.mrb[0].mxu1 %vm230_vm3, %v223_v57 }
 0x1ca   :  { %v300_v59 = vpop.f32.mrb[0].mxu1 }
 0x1cb   :  { %v301_v60 = vadd.f32 %v300_v59, %v228_v58  ;;  %v401_v61 = vpop.f32.mrb[1].mxu1 }
 0x1cd   :  { %v307_v62 = vrot.slane %v301_v60, 7  ;;  %305 = vst.msk [vmem:[#allocation2] sm:$0x3] %vm304_vm4, %v301_v60 }
 0x1ce   :  { %449 = shalt.err (!%p446_p4)
}
 0x1cf   :  { %s450_s12 = scalar_lea.hbm %s624_s5, 32 }
 0x1d0   :  { %p451_p5 = scmp.ne.s32.totalorder %s624_s5, %s450_s12  ;;  %p454_p6 = scmp.lt.u32.totalorder %s450_s12, %s624_s5 }
 0x1d2   :  { %p456_p7 = pnand %p454_p6, %p451_p5 }
 0x1d4   :  { %459 = shalt.err (!%p456_p7)
}
 0x1d5   :  { %322 = dma.vmem_to_hbm [thread:$0]  %s320_s7, 32, %s624_s5, [#allocation3]   ;;  %vm311_vm5 = vcmask 9217   ;;  %vm309_vm6 = vcmp.gt.f32.partialorder %v301_v60, %v307_v62 }
 0x1d6   :  { %v310_v63 = vsel %vm309_vm6, 1, %v486_v4  ;;  %s460_s19 = scalar_lea.vmem %s330_s9, 16  ;;  %s464_s20 = scalar_lea.vmem %s330_s9, 32 }
 0x1d7   :  { %312 = vst.msk [vmem:[#allocation4 - $0x1] sm:$0x2] %vm311_vm5, %v310_v63  ;;  %p461_p8 = scmp.ne.s32.totalorder %s330_s9, %s460_s19  ;;  %p465_p9 = scmp.lt.s32.totalorder %s330_s9, %s330_s9 }
 0x1d8   :  { %p466_p10 = scmp.lt.s32.totalorder %s464_s20, %s460_s19 }
 0x1da   :  { %p467_p11 = por %p466_p10, %p465_p9 }
 0x1dc   :  { %p468_p12 = pnand %p467_p11, %p461_p8 }
 0x1de   :  { %471 = shalt.err (!%p468_p12)
}
 0x1df   :  { %s472_s23 = scalar_lea.hbm %s625_s6, 16 }
 0x1e0   :  { %p473_p13 = scmp.ne.s32.totalorder %s625_s6, %s472_s23  ;;  %p476_p0 = scmp.lt.u32.totalorder %s472_s23, %s625_s6 }
 0x1e2   :  { %p478_p1 = pnand %p476_p0, %p473_p13 }
 0x1e4   :  { %481 = shalt.err (!%p478_p1)
}
 0x1e5   :  { %332 = dma.vmem_to_hbm [thread:$0]  %s330_s9, 16, %s625_s6, [#allocation5]  }
 0x1e6   :  { %482 = dma.done.wait [#allocation3], 32  }
 0x1e7   :  { %483 = vsyncadd [#allocation3], 4294967264 }
 0x1e8   :  { %484 = dma.done.wait [#allocation5], 16  }
 0x1e9   :  { %485 = vsyncadd [#allocation5], 4294967280 }
 0x1ea   :  { %339 = vsyncpa [#allocation3], 1 }
 0x1eb   :  { %340 = vsyncpa [#allocation5], 1 }

</bundles_post_ra>
